<compile_context>
chip_gen: v6e
topology: v6e:2x2x1
jax: 0.10.0
libtpu: 0.0.40
codegen_flags: <defaults>
</compile_context>

<pallas_src>
import functools
import numpy as np
import jax
import jax.numpy as jnp
from jax.experimental import pallas as pl
from jax.experimental.pallas import tpu as pltpu

_LANE = 128
_GRAIN = 1024                      # 8 sublane-tiles of 128 lanes
_VMEM_BLOCK_BUDGET = 24 * 1024 * 1024   # double-buffered block budget (v7x-safe)


def _mul(*factors):
    """Product of the non-None factors (None == empty product)."""
    acc = None
    for f in factors:
        if f is None:
            continue
        acc = f if acc is None else acc * f
    return acc


def _sin_cos_rows(x_ref, smu, sigma, d_dim, need_cos):
    """Returns per-feature dense (sub, 128) slabs: sin(sigma*x_d - sigma*mu_d)
    and (optionally) sigma*cos(...)."""
    sins, coss = [], []
    for d in range(d_dim):
        arg = sigma * x_ref[d] - smu[d]          # smu[d] is a Python float
        sins.append(jnp.sin(arg))
        if need_cos:
            coss.append(sigma * jnp.cos(arg))
    return sins, coss


# ---------------------------------------------------------------------------
# Kernels.  x block is (D, sub, 128); output block is (n_rows, sub, 128).
# ---------------------------------------------------------------------------
def g0_kernel(x_ref, o_ref, *, sigma, smu, d_dim):
    sins, _ = _sin_cos_rows(x_ref, smu, sigma, d_dim, need_cos=False)
    o_ref[0] = _mul(*sins)


def _prefix_suffix(sins, d_dim):
    prefix = [None] * d_dim
    acc = None
    for k in range(d_dim):
        prefix[k] = acc
        acc = sins[k] if acc is None else acc * sins[k]
    suffix = [None] * d_dim
    acc = None
    for k in range(d_dim - 1, -1, -1):
        suffix[k] = acc
        acc = sins[k] if acc is None else acc * sins[k]
    return prefix, suffix


def g1_kernel(x_ref, o_ref, *, sigma, smu, d_dim):
    sins, coss = _sin_cos_rows(x_ref, smu, sigma, d_dim, need_cos=True)
    prefix, suffix = _prefix_suffix(sins, d_dim)
    for k in range(d_dim):
        o_ref[k] = _mul(coss[k], prefix[k], suffix[k])   # direct per-row store


def g2_kernel(x_ref, o_ref, *, sigma, smu, d_dim):
    sins, coss = _sin_cos_rows(x_ref, smu, sigma, d_dim, need_cos=True)
    prefix, suffix = _prefix_suffix(sins, d_dim)

    # Diagonal: -sigma^2 * prod_d sin_d  (same value for every k).
    diag = (-(sigma * sigma)) * _mul(*sins)
    for k in range(d_dim):
        o_ref[k * d_dim + k] = diag

    # Off-diagonal (symmetric, compute once for k<j):
    #   H[k,j] = sigma*cos_k * sigma*cos_j * prod_{d!=k,j} sin_d
    #          = coss[k]*coss[j] * prefix[k] * mid(k+1..j-1) * suffix[j]
    for k in range(d_dim):
        mid = None                               # prod sins[k+1 .. j-1]
        for j in range(k + 1, d_dim):
            val = _mul(coss[k], coss[j], prefix[k], mid, suffix[j])
            o_ref[k * d_dim + j] = val
            o_ref[j * d_dim + k] = val
            mid = sins[j] if mid is None else mid * sins[j]


# ---------------------------------------------------------------------------
# Wrapper: lane/sublane-dense layout, balanced tiling, pad/strip, reshape back.
# ---------------------------------------------------------------------------
@functools.partial(jax.jit, static_argnames=("smu", "sigma", "diff_order"))
def _sin_test_impl(x, *, smu, sigma, diff_order):
    B, N, D = x.shape
    M = B * N

    if diff_order == 0:
        kern, n_rows = g0_kernel, 1
    elif diff_order == 1:
        kern, n_rows = g1_kernel, D
    else:
        kern, n_rows = g2_kernel, D * D

    # --- tile sizing ---------------------------------------------------
    target = 32768 if diff_order < 2 else 16384          # samples per step
    bytes_per_sample = 2 * (D + n_rows) * 4               # double-buffered I/O
    tile_cap = max(_GRAIN,
                   (_VMEM_BLOCK_BUDGET // bytes_per_sample) // _GRAIN * _GRAIN)
    tile_target = min(target, tile_cap)

    m_pad_min = pl.cdiv(M, _GRAIN) * _GRAIN
    n_tiles = pl.cdiv(m_pad_min, tile_target)
    if n_tiles < 2 and m_pad_min >= 2 * _GRAIN:
        n_tiles = 2                                       # keep both v7x TCs busy
    tile = pl.cdiv(pl.cdiv(m_pad_min, n_tiles), _GRAIN) * _GRAIN
    M_pad = n_tiles * tile
    sub = tile // _LANE                                   # multiple of 8

    vmem_limit = int(min(48 * 1024 * 1024,
                         max(16 * 1024 * 1024,
                             2 * (D + n_rows) * tile * 4 + (4 << 20))))

    # --- lane/sublane-dense input layout: (D, M_pad//128, 128) ----------
    xt = x.reshape(M, D).T                                # (D, M)
    if M_pad != M:
        xt = jnp.pad(xt, ((0, 0), (0, M_pad - M)))
    xt = xt.reshape(D, M_pad // _LANE, _LANE)

    out = pl.pallas_call(
        functools.partial(kern, sigma=sigma, smu=smu, d_dim=D),
        out_shape=jax.ShapeDtypeStruct((n_rows, M_pad // _LANE, _LANE),
                                       jnp.float32),
        grid=(M_pad // tile,),
        in_specs=[pl.BlockSpec((D, sub, _LANE), lambda i: (0, i, 0))],
        out_specs=pl.BlockSpec((n_rows, sub, _LANE), lambda i: (0, i, 0)),
        compiler_params=pltpu.CompilerParams(
            dimension_semantics=("parallel",),
            vmem_limit_bytes=vmem_limit),
    )(xt)

    out = out.reshape(n_rows, M_pad)[:, :M]               # strip padding
    if diff_order == 0:
        return out.reshape(B, N)
    if diff_order == 1:
        return out.T.reshape(B, N, D)
    return out.T.reshape(B, N, D, D)                      # row k*D+j -> [..., k, j]


def sin_test_forward(x, mu, sigma, diff_order=0):
    """Pallas implementation of SinTest.forward (mu/sigma fixed at construction)."""
    if diff_order not in (0, 1, 2):
        raise RuntimeError(
            "higher order derivatives of the gaussian has not bee implemented!")
    x = jnp.asarray(x, jnp.float32)
    sigma = float(sigma)
    # sigma*mu folded as static immediates (algebraically == sigma*(x - mu)).
    smu = tuple(float(v) for v in (np.asarray(mu, np.float32) * sigma))
    return _sin_test_impl(x, smu=smu, sigma=sigma, diff_order=int(diff_order))


# ---------------------------------------------------------------------------
# Pure-numpy reference mirroring the PyTorch module exactly.
# ---------------------------------------------------------------------------
def ref_forward(x, mu, sigma, diff_order):
    x = np.asarray(x, np.float32)
    mu = np.asarray(mu, np.float32)
    sigma = float(sigma)
    B, N, D = x.shape
    arg = sigma * (x - mu[None, None, :])
    sinv = np.sin(arg)
    cosv = sigma * np.cos(arg)
    if diff_order == 0:
        return np.prod(sinv, axis=-1)
    if diff_order == 1:
        out = np.ones((B, N, D), np.float32)
        for k in range(D):
            for d in range(D):
                out[:, :, k] *= cosv[:, :, d] if d == k else sinv[:, :, d]
        return out
    out = np.ones((B, N, D, D), np.float32)
    for k in range(D):
        for j in range(D):
            if k == j:
                out[:, :, k, j] = -np.prod(sinv, axis=-1) * sigma ** 2
            else:
                for d in range(D):
                    if d == k or d == j:
                        out[:, :, k, j] *= cosv[:, :, d]
                    else:
                        out[:, :, k, j] *= sinv[:, :, d]
    return out


if __name__ == "__main__":
    key = jax.random.PRNGKey(0)
    ok = True
    # Small shapes; they exercise padding (B*N not a multiple of 128/1024) and
    # several feature dims (incl. D=4 -> 16 Hessian rows, symmetry path).
    for (B, N, D) in ((2, 8, 3), (2, 50, 2), (1, 300, 4)):
        key, kx, kmu = jax.random.split(key, 3)
        x = jax.random.normal(kx, (B, N, D), dtype=jnp.float32)
        mu = jax.random.normal(kmu, (D,), dtype=jnp.float32)
        sigma = 1.3
        for order in (0, 1, 2):
            out = jax.block_until_ready(
                sin_test_forward(x, mu, sigma, diff_order=order))
            ref = ref_forward(np.asarray(x), np.asarray(mu), sigma, order)
            if out.shape != ref.shape or not np.allclose(
                    np.asarray(out), ref, atol=1e-5, rtol=1e-5):
                ok = False
                print(f"MISMATCH at B={B} N={N} D={D} diff_order={order}")
    if ok:
        print("KERNEL_OK")
</pallas_src>

<mosaic_0001>
module attributes {stable_mosaic.version = 11 : i64} {
  func.func @g0_kernel(%arg0: i32, %arg1: memref<3x8x128xf32, #tpu.memory_space<vmem>>, %arg2: memref<1x8x128xf32, #tpu.memory_space<vmem>>) attributes {dimension_semantics = [#tpu.dimension_semantics<parallel>], iteration_bounds = array<i64: 1>, scalar_prefetch = 0 : i64, scratch_operands = 0 : i64, tpu.core_type = #tpu.core_type<tc>, window_params = [{transform_indices = @transform_0, window_bounds = array<i64: 3, 8, 128>}, {transform_indices = @transform_1, window_bounds = array<i64: 1, 8, 128>}]} {
    %c0 = arith.constant 0 : index
    %c0_0 = arith.constant 0 : index
    %c0_1 = arith.constant 0 : index
    %0 = vector.load %arg1[%c0, %c0_0, %c0_1] : memref<3x8x128xf32, #tpu.memory_space<vmem>>, vector<1x8x128xf32>
    %1 = vector.shape_cast %0 : vector<1x8x128xf32> to vector<8x128xf32>
    %cst = arith.constant 1.300000e+00 : f32
    %2 = vector.broadcast %cst : f32 to vector<8x128xf32>
    %3 = arith.mulf %2, %1 : vector<8x128xf32>
    %cst_2 = arith.constant 1.68432665 : f32
    %4 = vector.broadcast %cst_2 : f32 to vector<8x128xf32>
    %5 = arith.subf %3, %4 : vector<8x128xf32>
    %6 = math.sin %5 : vector<8x128xf32>
    %c1 = arith.constant 1 : index
    %c0_3 = arith.constant 0 : index
    %c0_4 = arith.constant 0 : index
    %7 = vector.load %arg1[%c1, %c0_3, %c0_4] : memref<3x8x128xf32, #tpu.memory_space<vmem>>, vector<1x8x128xf32>
    %8 = vector.shape_cast %7 : vector<1x8x128xf32> to vector<8x128xf32>
    %cst_5 = arith.constant 1.300000e+00 : f32
    %9 = vector.broadcast %cst_5 : f32 to vector<8x128xf32>
    %10 = arith.mulf %9, %8 : vector<8x128xf32>
    %cst_6 = arith.constant 1.76151359 : f32
    %11 = vector.broadcast %cst_6 : f32 to vector<8x128xf32>
    %12 = arith.subf %10, %11 : vector<8x128xf32>
    %13 = math.sin %12 : vector<8x128xf32>
    %c2 = arith.constant 2 : index
    %c0_7 = arith.constant 0 : index
    %c0_8 = arith.constant 0 : index
    %14 = vector.load %arg1[%c2, %c0_7, %c0_8] : memref<3x8x128xf32, #tpu.memory_space<vmem>>, vector<1x8x128xf32>
    %15 = vector.shape_cast %14 : vector<1x8x128xf32> to vector<8x128xf32>
    %cst_9 = arith.constant 1.300000e+00 : f32
    %16 = vector.broadcast %cst_9 : f32 to vector<8x128xf32>
    %17 = arith.mulf %16, %15 : vector<8x128xf32>
    %cst_10 = arith.constant -0.532487214 : f32
    %18 = vector.broadcast %cst_10 : f32 to vector<8x128xf32>
    %19 = arith.subf %17, %18 : vector<8x128xf32>
    %20 = math.sin %19 : vector<8x128xf32>
    %21 = arith.mulf %6, %13 : vector<8x128xf32>
    %22 = arith.mulf %21, %20 : vector<8x128xf32>
    %c0_11 = arith.constant 0 : index
    %c0_12 = arith.constant 0 : index
    %c0_13 = arith.constant 0 : index
    %23 = vector.load %arg2[%c0_11, %c0_12, %c0_13] : memref<1x8x128xf32, #tpu.memory_space<vmem>>, vector<1x8x128xf32>
    %24 = vector.shape_cast %23 : vector<1x8x128xf32> to vector<8x128xf32>
    %25 = vector.shape_cast %22 : vector<8x128xf32> to vector<1x8x128xf32>
    tpu.vector_store %arg2[%c0_11, %c0_12, %c0_13], %25 {strides = array<i32>} : memref<1x8x128xf32, #tpu.memory_space<vmem>>, vector<1x8x128xf32>,
    return
  }
  func.func @transform_0(%arg0: i32) -> (i32, i32, i32) {
    %c0_i32 = arith.constant 0 : i32
    %c0_i32_0 = arith.constant 0 : i32
    %c0_i32_1 = arith.constant 0 : i32
    return %c0_i32, %arg0, %c0_i32_0 : i32, i32, i32
  }
  func.func @transform_1(%arg0: i32) -> (i32, i32, i32) {
    %c0_i32 = arith.constant 0 : i32
    %c0_i32_0 = arith.constant 0 : i32
    %c0_i32_1 = arith.constant 0 : i32
    return %c0_i32, %arg0, %c0_i32_0 : i32, i32, i32
  }
}

</mosaic_0001>

<bundles_post_ra>
// kernel: _sin_test_impl.1
= control target key start
LH: loop header
LB: loop body
LE: loop exit
PB: predicated region body
PF: predicated region fallthrough
CT: control target
= control target key end

     0   :  { %v385_v34 = vmov 683565275   ;;  %v386_v36 = vmov 2475754826   ;;  %v387_v38 = vmov 2131351028   ;;  %s605_s0 = inlined_call_operand.vmem [shape: f32[3,8,128], index: 0, kind: input, shape index: {}]   ;;  %s606_s1 = inlined_call_operand.vmem [shape: f32[1,8,128], index: 1, kind: output, shape index: {}]  }
   0x1   :  { %v8_v0 = vld [vmem:[%s605_s0] sm:$0xff]  ;;  %v343_v1 = vld [vmem:[%s605_s0 + $0x8] sm:$0xff]  ;;  %v349_v4 = vld [vmem:[%s605_s0 + $0x10] sm:$0xff]  ;;  %v388_v40 = vmov 2102212464  }
   0x2   :  { %v9_v2 = vmul.f32 1.3, %v8_v0  ;;  %v117_v3 = vmul.f32 1.3, %v343_v1  ;;  %v225_v9 = vmul.f32 1.3, %v349_v4 }
   0x3   :  { %v389_v42 = vmov 920167782   ;;  %v390_v50 = vmov 1326507024  }
   0x4   :  { %v410_v5 = vadd.f32 -1.6843266, %v9_v2  ;;  %v412_v6 = vadd.f32 -1.7615136, %v117_v3  ;;  %v422_v17 = vadd.f32 0.5324872, %v225_v9 }
   0x6   :  { %v11_v7 = vand.u32 2147483647, %v410_v5  ;;  %v14_v8 = vand.u32 2139095040, %v410_v5  ;;  %v119_v10 = vand.u32 2147483647, %v412_v6  ;;  %v122_v11 = vand.u32 2139095040, %v412_v6 }
   0x7   :  { %v230_v23 = vand.u32 2139095040, %v422_v17 }
   0x8   :  { %v15_v12 = vshrl.u32 %v14_v8, 23  ;;  %v18_v13 = vand.u32 8388607, %v11_v7  ;;  %v123_v14 = vshrl.u32 %v122_v11, 23  ;;  %v126_v15 = vand.u32 8388607, %v119_v10 }
   0x9   :  { %v231_v25 = vshrl.u32 %v230_v23, 23 }
   0xa   :  { %v339_v16 = vadd.s32 4294967169, %v15_v12  ;;  %v345_v18 = vadd.s32 4294967169, %v123_v14  ;;  %v19_v20 = vor.u32 8388608, %v18_v13  ;;  %v127_v21 = vor.u32 8388608, %v126_v15 }
   0xb   :  { %v436_v44 = vadd.s32 4294967169, %v231_v25 }
   0xc   :  { %v21_v19 = vadd.s32 1, %v339_v16  ;;  %v129_v22 = vadd.s32 1, %v345_v18  ;;  %v425_v29 = vshll.u32 %v19_v20, 8  ;;  %v429_v32 = vshll.u32 %v127_v21, 8 }
   0xe   :  { %vm22_vm0 = vcmp.gt.s32.totalorder %v21_v19, 0  ;;  %vm130_vm1 = vcmp.gt.s32.totalorder %v129_v22, 0 }
   0xf   :  { %v23_v24 = vsel %vm22_vm0, %v21_v19, 0  ;;  %v131_v28 = vsel %vm130_vm1, %v129_v22, 0 }
  0x10   :  { %v24_v26 = vshrl.u32 %v23_v24, 5  ;;  %v25_v27 = vand.u32 31, %v23_v24  ;;  %v427_v30 = vshrl.u32 %v131_v28, 5  ;;  %v133_v31 = vand.u32 31, %v131_v28 }
  0x12   :  { %v26_v33 = vsub.s32 32, %v25_v27  ;;  %v28_v35 = vshll.u32 %v385_v34, %v25_v27  ;;  %v31_v37 = vshll.u32 %v386_v36, %v25_v27  ;;  %v34_v39 = vshll.u32 %v387_v38, %v25_v27 }
  0x13   :  { %v37_v41 = vshll.u32 %v388_v40, %v25_v27  ;;  %v40_v43 = vshll.u32 %v389_v42, %v25_v27  ;;  %vm43_vm2 = vcmp.lt.s32.totalorder %v24_v26, 1  ;;  %vm44_vm3 = vcmp.lt.s32.totalorder %v24_v26, 2 }
  0x14   :  { %v27_v45 = vshrl.u32 %v385_v34, %v26_v33  ;;  %v29_v46 = vshrl.u32 %v386_v36, %v26_v33  ;;  %v32_v47 = vshrl.u32 %v387_v38, %v26_v33  ;;  %v35_v48 = vshrl.u32 %v388_v40, %v26_v33 }
  0x15   :  { %v38_v49 = vshrl.u32 %v389_v42, %v26_v33  ;;  %v41_v51 = vshrl.u32 %v390_v50, %v26_v33  ;;  %vm46_vm4 = vcmp.lt.s32.totalorder %v24_v26, 4  ;;  %v134_v55 = vsub.s32 32, %v133_v31 }
  0x16   :  { %v30_v52 = vor.u32 %v29_v46, %v28_v35  ;;  %v33_v53 = vor.u32 %v32_v47, %v31_v37  ;;  %v36_v54 = vor.u32 %v35_v48, %v34_v39  ;;  %vm45_vm5 = vcmp.lt.s32.totalorder %v24_v26, 3 }
  0x17   :  { %v39_v56 = vor.u32 %v38_v49, %v37_v41  ;;  %v42_v57 = vor.u32 %v41_v51, %v40_v43  ;;  %v136_v58 = vshll.u32 %v385_v34, %v133_v31  ;;  %v139_v2 = vshll.u32 %v386_v36, %v133_v31 }
  0x18   :  { %v47_v59 = vsel %vm43_vm2, %v27_v45, %v30_v52  ;;  %v48_v60 = vsel %vm46_vm4, %v36_v54, 2102212464  ;;  %v51_v61 = vsel %vm43_vm2, %v30_v52, %v33_v53  ;;  %v55_v62 = vsel %vm43_vm2, %v33_v53, %v36_v54 }
  0x19   :  { %v49_v63 = vsel %vm45_vm5, %v33_v53, %v48_v60  ;;  %v52_v0 = vsel %vm46_vm4, %v39_v56, 920167782  ;;  %v56_v1 = vsel %vm46_vm4, %v42_v57, 1326507024  ;;  %v135_v8 = vshrl.u32 %v385_v34, %v134_v55 }
  0x1a   :  { %v53_v3 = vsel %vm45_vm5, %v36_v54, %v52_v0  ;;  %v57_v4 = vsel %vm45_vm5, %v39_v56, %v56_v1  ;;  %v137_v9 = vshrl.u32 %v386_v36, %v134_v55  ;;  %v50_v11 = vsel %vm44_vm3, %v47_v59, %v49_v63 }
  0x1b   :  { %v54_v12 = vsel %vm44_vm3, %v51_v61, %v53_v3  ;;  %v58_v13 = vsel %vm44_vm3, %v55_v62, %v57_v4  ;;  %v140_v14 = vshrl.u32 %v387_v38, %v134_v55  ;;  %v142_v22 = vshll.u32 %v387_v38, %v133_v31 }
  0x1c   :  { %v456_v15 = vmul.u32.u64.low %v425_v29, %v58_v13  ;;  %v457_v16 = vmul.u32.u64.high %v425_v29, %v58_v13, %v456_v15  ;;  %v460_v18 = vmul.u32.u64.low %v425_v29, %v54_v12  ;;  %v461_v19 = vmul.u32.u64.high %v425_v29, %v54_v12, %v460_v18 }
  0x1d   :  { %v138_v20 = vor.u32 %v137_v9, %v136_v58  ;;  %v141_v21 = vor.u32 %v140_v14, %v139_v2  ;;  %v143_v23 = vshrl.u32 %v388_v40, %v134_v55  ;;  %v145_v24 = vshll.u32 %v388_v40, %v133_v31 }
  0x1e   :  { %v146_v25 = vshrl.u32 %v389_v42, %v134_v55  ;;  %v148_v26 = vshll.u32 %v389_v42, %v133_v31  ;;  %v149_v27 = vshrl.u32 %v390_v50, %v134_v55  ;;  %v66_v28 = vmul.u32 %v425_v29, %v50_v11 }
  0x1f   :  { %v144_v33 = vor.u32 %v143_v23, %v142_v22  ;;  %vm151_vm6 = vcmp.lt.s32.totalorder %v427_v30, 1  ;;  %vm152_vm7 = vcmp.lt.s32.totalorder %v427_v30, 2  ;;  %vm68_vm8 = vc.u32 %v457_v16, %v460_v18 }
  0x20   :  { %v69_v35 = vadd.s32 1, %v461_v19  ;;  %v147_v37 = vor.u32 %v146_v25, %v145_v24  ;;  %vm153_vm9 = vcmp.lt.s32.totalorder %v427_v30, 3  ;;  %v150_v39 = vor.u32 %v149_v27, %v148_v26 }
  0x21   :  { %vm154_vm10 = vcmp.lt.s32.totalorder %v427_v30, 4  ;;  %v155_v31 = vsel %vm151_vm6, %v135_v8, %v138_v20  ;;  %v159_v41 = vsel %vm151_vm6, %v138_v20, %v141_v21  ;;  %v163_v46 = vsel %vm151_vm6, %v141_v21, %v144_v33 }
  0x22   :  { %v70_v29 = vsel %vm68_vm8, %v69_v35, %v461_v19  ;;  %v156_v43 = vsel %vm154_vm10, %v144_v33, 2102212464  ;;  %v160_v45 = vsel %vm154_vm10, %v147_v37, 920167782  ;;  %v164_v51 = vsel %vm154_vm10, %v150_v39, 1326507024 }
  0x23   :  { %v71_v47 = vadd.s32 %v70_v29, %v66_v28  ;;  %v157_v48 = vsel %vm153_vm9, %v141_v21, %v156_v43  ;;  %v161_v49 = vsel %vm153_vm9, %v144_v33, %v160_v45  ;;  %v165_v54 = vsel %vm153_vm9, %v147_v37, %v164_v51 }
  0x24   :  { %v158_v52 = vsel %vm152_vm7, %v155_v31, %v157_v48  ;;  %v162_v53 = vsel %vm152_vm7, %v159_v41, %v161_v49  ;;  %v237_v55 = vadd.s32 1, %v436_v44  ;;  %v166_v57 = vsel %vm152_vm7, %v163_v46, %v165_v54 }
  0x25   :  { %v72_v56 = vadd.s32 536870912, %v71_v47  ;;  %v487_v58 = vmul.u32.u64.low %v429_v32, %v162_v53  ;;  %v488_v59 = vmul.u32.u64.high %v429_v32, %v162_v53, %v487_v58  ;;  %v174_v0 = vmul.u32 %v429_v32, %v158_v52 }
  0x26   :  { %v492_v60 = vmul.u32.u64.low %v429_v32, %v166_v57  ;;  %v493_v61 = vmul.u32.u64.high %v429_v32, %v166_v57, %v492_v60  ;;  %vm238_vm11 = vcmp.gt.s32.totalorder %v237_v55, 0  ;;  %v227_v2 = vand.u32 2147483647, %v422_v17 }
  0x27   :  { %v495_v62 = vshrl.u32 %v72_v56, 30  ;;  %v239_v63 = vsel %vm238_vm11, %v237_v55, 0  ;;  %v177_v30 = vadd.s32 1, %v488_v59  ;;  %vm13_vm4 = vcmp.lt.s32.totalorder %v410_v5, 0 }
  0x28   :  { %v241_v44 = vand.u32 31, %v239_v63  ;;  %vm176_vm12 = vc.u32 %v493_v61, %v487_v58  ;;  %v234_v32 = vand.u32 8388607, %v227_v2  ;;  %v240_v24 = vshrl.u32 %v239_v63, 5 }
  0x29   :  { %v74_v1 = vshll.u32 %v495_v62, 30  ;;  %v178_v8 = vsel %vm176_vm12, %v177_v30, %v488_v59  ;;  %vm121_vm5 = vcmp.lt.s32.totalorder %v412_v6, 0  ;;  %vm554_vm6 = vcmp.le.f32.partialorder %v11_v7, 0.7853982 }
  0x2a   :  { %v242_v3 = vsub.s32 32, %v241_v44  ;;  %v179_v9 = vadd.s32 %v178_v8, %v174_v0  ;;  %v244_v13 = vshll.u32 %v385_v34, %v241_v44  ;;  %v247_v15 = vshll.u32 %v386_v36, %v241_v44 }
  0x2b   :  { %v503_v4 = vsub.s32 %v71_v47, %v74_v1  ;;  %v250_v21 = vshll.u32 %v387_v38, %v241_v44  ;;  %v253_v25 = vshll.u32 %v388_v40, %v241_v44  ;;  %v256_v28 = vshll.u32 %v389_v42, %v241_v44 }
  0x2c   :  { %v180_v12 = vadd.s32 536870912, %v179_v9  ;;  %v245_v14 = vshrl.u32 %v386_v36, %v242_v3  ;;  %v248_v20 = vshrl.u32 %v387_v38, %v242_v3  ;;  %v251_v22 = vshrl.u32 %v388_v40, %v242_v3 }
  0x2d   :  { %v77_v11 = vsub.s32 0, %v503_v4  ;;  %v254_v26 = vshrl.u32 %v389_v42, %v242_v3  ;;  %v257_v36 = vshrl.u32 %v390_v50, %v242_v3  ;;  %v235_v35 = vor.u32 8388608, %v234_v32 }
  0x2e   :  { %v516_v23 = vshrl.u32 %v180_v12, 30  ;;  %v243_v37 = vshrl.u32 %v385_v34, %v242_v3  ;;  %v246_v39 = vor.u32 %v245_v14, %v244_v13  ;;  %v249_v31 = vor.u32 %v248_v20, %v247_v15 }
  0x2f   :  { %v340_v19 = vmin.u32 %v77_v11, %v503_v4  ;;  %v252_v41 = vor.u32 %v251_v22, %v250_v21  ;;  %v255_v43 = vor.u32 %v254_v26, %v253_v25  ;;  %vm259_vm13 = vcmp.lt.s32.totalorder %v240_v24, 1 }
  0x30   :  { %v182_v33 = vshll.u32 %v516_v23, 30  ;;  %vm262_vm14 = vcmp.lt.s32.totalorder %v240_v24, 4  ;;  %v67_v40 = vadd.s32 %v460_v18, %v457_v16  ;;  %v258_v42 = vor.u32 %v257_v36, %v256_v28 }
  0x31   :  { %v79_v27 = vclz %v340_v19  ;;  %v264_v50 = vsel %vm262_vm14, %v252_v41, 2102212464  ;;  %vm261_vm0 = vcmp.lt.s32.totalorder %v240_v24, 3  ;;  %v275_v47 = vshll.u32 %v235_v35, 8 }
  0x32   :  { %v183_v29 = vsub.s32 %v179_v9, %v182_v33  ;;  %vm260_vm1 = vcmp.lt.s32.totalorder %v240_v24, 2  ;;  %v263_v48 = vsel %vm259_vm13, %v243_v37, %v246_v39  ;;  %v267_v49 = vsel %vm259_vm13, %v246_v39, %v249_v31 }
  0x33   :  { %v341_v38 = vadd.s32 4294967294, %v79_v27  ;;  %v265_v53 = vsel %vm261_vm0, %v249_v31, %v264_v50  ;;  %v268_v16 = vsel %vm262_vm14, %v255_v43, 920167782  ;;  %v271_v55 = vsel %vm259_vm13, %v249_v31, %v252_v41 }
  0x34   :  { %v185_v46 = vsub.s32 0, %v183_v29  ;;  %v269_v54 = vsel %vm261_vm0, %v252_v41, %v268_v16  ;;  %v272_v56 = vsel %vm262_vm14, %v258_v42, 1326507024  ;;  %v266_v60 = vsel %vm260_vm1, %v263_v48, %v265_v53 }
  0x35   :  { %vm342_vm15 = vcmp.lt.s32.totalorder %v341_v38, 0  ;;  %v270_v63 = vsel %vm260_vm1, %v267_v49, %v269_v54  ;;  %v273_v0 = vsel %vm261_vm0, %v255_v43, %v272_v56  ;;  %v282_v13 = vmul.u32 %v275_v47, %v266_v60 }
  0x36   :  { %v82_v45 = vsel %vm342_vm15, 0, %v341_v38  ;;  %v346_v52 = vmin.u32 %v185_v46, %v183_v29  ;;  %v274_v1 = vsel %vm260_vm1, %v271_v55, %v273_v0  ;;  %vm562_vm7 = vcmp.le.f32.partialorder %v119_v10, 0.7853982 }
  0x37   :  { %v87_v34 = vsub.s32 4294967266, %v82_v45  ;;  %v83_v51 = vsub.s32 32, %v82_v45  ;;  %v84_v59 = vshll.u32 %v503_v4, %v82_v45  ;;  %v175_v4 = vadd.s32 %v487_v58, %v493_v61 }
  0x38   :  { %v187_v57 = vclz %v346_v52  ;;  %v539_v30 = vmul.u32.u64.low %v275_v47, %v270_v63  ;;  %v540_v3 = vmul.u32.u64.high %v275_v47, %v270_v63, %v539_v30  ;;  %v97_v55 = vsub.s32 4, %v495_v62 }
  0x39   :  { %v88_v18 = vadd.s32 127, %v87_v34  ;;  %v85_v8 = vshrl.u32 %v67_v40, %v83_v51  ;;  %v542_v11 = vmul.u32.u64.low %v275_v47, %v274_v1  ;;  %v543_v32 = vmul.u32.u64.high %v275_v47, %v274_v1, %v542_v11 }
  0x3a   :  { %v347_v44 = vadd.s32 4294967294, %v187_v57  ;;  %v285_v20 = vadd.s32 1, %v540_v3  ;;  %v205_v56 = vsub.s32 4, %v516_v23  ;;  %v98_v0 = vsel %vm13_vm4, %v97_v55, %v495_v62 }
  0x3b   :  { %v89_v9 = vshll.u32 %v88_v18, 23  ;;  %v86_v21 = vor.u32 %v85_v8, %v84_v59  ;;  %vm284_vm3 = vc.u32 %v543_v32, %v539_v30  ;;  %v283_v52 = vadd.s32 %v539_v30, %v543_v32 }
  0x3c   :  { %vm348_vm2 = vcmp.lt.s32.totalorder %v347_v44, 0  ;;  %v286_v26 = vsel %vm284_vm3, %v285_v20, %v540_v3  ;;  %v100_v8 = vsel %vm554_vm6, 0, %v98_v0  ;;  %vm229_vm9 = vcmp.lt.s32.totalorder %v422_v17, 0 }
  0x3d   :  { %v190_v12 = vsel %vm348_vm2, 0, %v347_v44  ;;  %v90_v22 = vor.u32 4788187, %v89_v9  ;;  %v287_v27 = vadd.s32 %v286_v26, %v282_v13  ;;  %v93_v61 = vcvt.s32.f32 %v86_v21 }
  0x3e   :  { %v191_v14 = vsub.s32 32, %v190_v12  ;;  %v192_v15 = vshll.u32 %v183_v29, %v190_v12  ;;  %v195_v19 = vsub.s32 4294967266, %v190_v12  ;;  %v206_v44 = vsel %vm121_vm5, %v205_v56, %v516_v23 }
  0x3f   :  { %v91_v58 = vand.u32 2147483647, %v90_v22  ;;  %v288_v33 = vadd.s32 536870912, %v287_v27  ;;  %v208_v9 = vsel %vm562_vm7, 0, %v206_v44  ;;  %vm590_vm10 = vcmp.le.f32.partialorder %v227_v2, 0.7853982 }
  0x40   :  { %v193_v24 = vshrl.u32 %v175_v4, %v191_v14  ;;  %v196_v25 = vadd.s32 127, %v195_v19  ;;  %v104_v4 = vadd.s32 3, %v100_v8  ;;  %v212_v12 = vadd.s32 3, %v208_v9 }
  0x41   :  { %v289_v38 = vshrl.u32 %v288_v33, 30  ;;  %v94_v31 = vmul.f32 %v93_v61, %v91_v58  ;;  %vm103_vm1 = vweird.f32 %v410_v5  ;;  %vm211_vm2 = vweird.f32 %v412_v6 }
  0x42   :  { %v194_v28 = vor.u32 %v193_v24, %v192_v15  ;;  %v197_v36 = vshll.u32 %v196_v25, 23  ;;  %v105_v24 = vand.u32 3, %v104_v4  ;;  %v213_v25 = vand.u32 3, %v212_v12 }
  0x43   :  { %v290_v41 = vshll.u32 %v289_v38, 30  ;;  %v95_v40 = vxor.u32 2147483648, %v94_v31  ;;  %v313_v32 = vsub.s32 4, %v289_v38 }
  0x44   :  { %v198_v35 = vor.u32 4788187, %v197_v36  ;;  %v201_v37 = vcvt.s32.f32 %v194_v28  ;;  %vm107_vm11 = vcmp.eq.s32.totalorder %v105_v24, 0  ;;  %vm110_vm12 = vcmp.eq.s32.totalorder %v105_v24, 2 }
  0x45   :  { %v291_v43 = vsub.s32 %v287_v27, %v290_v41  ;;  %v96_v47 = vsel %vm13_vm4, %v95_v40, %v94_v31  ;;  %v314_v20 = vsel %vm229_vm9, %v313_v32, %v289_v38  ;;  %vm215_vm13 = vcmp.eq.s32.totalorder %v213_v25, 0 }
  0x46   :  { %v199_v39 = vand.u32 2147483647, %v198_v35  ;;  %v99_v7 = vsel %vm554_vm6, %v410_v5, %v96_v47  ;;  %v316_v2 = vsel %vm590_vm10, 0, %v314_v20  ;;  %vm218_vm14 = vcmp.eq.s32.totalorder %v213_v25, 2 }
  0x47   :  { %v293_v42 = vsub.s32 0, %v291_v43  ;;  %373 = vcosq.f32 %v99_v7  ;;  %v320_v58 = vadd.s32 3, %v316_v2  ;;  %vm106_vm15 = vcmp.lt.s32.totalorder %v105_v24, 2 }
  0x48   :  { %v202_v29 = vmul.f32 %v201_v37, %v199_v39  ;;  %375 = vsinq.f32 %v99_v7  ;;  %vm214_vm0 = vcmp.lt.s32.totalorder %v213_v25, 2  ;;  %vm319_vm6 = vweird.f32 %v422_v17 }
  0x49   :  { %v352_v45 = vmin.u32 %v293_v42, %v291_v43  ;;  %v321_v38 = vand.u32 3, %v320_v58 }
  0x4a   :  { %v203_v50 = vxor.u32 2147483648, %v202_v29 }
  0x4b   :  { %v295_v34 = vclz %v352_v45  ;;  %vm326_vm3 = vcmp.eq.s32.totalorder %v321_v38, 2  ;;  %vm323_vm4 = vcmp.eq.s32.totalorder %v321_v38, 0 }
  0x4c   :  { %v204_v49 = vsel %vm121_vm5, %v203_v50, %v202_v29  ;;  %vm322_vm5 = vcmp.lt.s32.totalorder %v321_v38, 2 }
  0x4d   :  { %v353_v51 = vadd.s32 4294967294, %v295_v34  ;;  %v207_v53 = vsel %vm562_vm7, %v412_v6, %v204_v49 }
  0x4e   :  { %377 = vcosq.f32 %v207_v53 }
  0x4f   :  { %vm354_vm8 = vcmp.lt.s32.totalorder %v353_v51, 0  ;;  %379 = vsinq.f32 %v207_v53 }
  0x50   :  { %v298_v16 = vsel %vm354_vm8, 0, %v353_v51 }
  0x51   :  { %v299_v10 = vsub.s32 32, %v298_v16  ;;  %v300_v18 = vshll.u32 %v291_v43, %v298_v16  ;;  %v303_v54 = vsub.s32 4294967266, %v298_v16 }
  0x53   :  { %v301_v57 = vshrl.u32 %v283_v52, %v299_v10  ;;  %v304_v59 = vadd.s32 127, %v303_v54 }
  0x54   :  { %v374_v13 = vpop.eup %373 }
  0x55   :  { %v302_v60 = vor.u32 %v301_v57, %v300_v18  ;;  %v305_v63 = vshll.u32 %v304_v59, 23  ;;  %v376_v14 = vpop.eup %375  ;;  %v111_v27 = vxor.u32 2147483648, %v374_v13 }
  0x56   :  { %v108_v26 = vxor.u32 2147483648, %v376_v14 }
  0x57   :  { %v306_v1 = vor.u32 4788187, %v305_v63  ;;  %v309_v30 = vcvt.s32.f32 %v302_v60  ;;  %v112_v33 = vsel %vm110_vm12, %v111_v27, %v376_v14 }
  0x58   :  { %v109_v61 = vsel %vm107_vm11, %v374_v13, %v108_v26 }
  0x59   :  { %v307_v3 = vand.u32 2147483647, %v306_v1  ;;  %v113_v39 = vsel %vm106_vm15, %v109_v61, %v112_v33 }
  0x5a   :  { %v114_v29 = vsel %vm103_vm1, nan, %v113_v39 }
  0x5b   :  { %v310_v11 = vmul.f32 %v309_v30, %v307_v3  ;;  %v378_v19 = vpop.eup %377 }
  0x5c   :  { %v380_v22 = vpop.eup %379  ;;  %v219_v36 = vxor.u32 2147483648, %v378_v19 }
  0x5d   :  { %v311_v23 = vxor.u32 2147483648, %v310_v11  ;;  %v216_v28 = vxor.u32 2147483648, %v380_v22 }
  0x5e   :  { %v220_v37 = vsel %vm218_vm14, %v219_v36, %v380_v22 }
  0x5f   :  { %v312_v15 = vsel %vm229_vm9, %v311_v23, %v310_v11  ;;  %v217_v35 = vsel %vm215_vm13, %v378_v19, %v216_v28 }
  0x60   :  { %v315_v21 = vsel %vm590_vm10, %v422_v17, %v312_v15  ;;  %v221_v31 = vsel %vm214_vm0, %v217_v35, %v220_v37 }
  0x61   :  { %381 = vcosq.f32 %v315_v21  ;;  %v222_v43 = vsel %vm211_vm2, nan, %v221_v31 }
  0x62   :  { %383 = vsinq.f32 %v315_v21  ;;  %v331_v46 = vmul.f32 %v222_v43, %v114_v29 }
  0x6e   :  { %v382_v41 = vpop.eup %381 }
  0x6f   :  { %v384_v40 = vpop.eup %383  ;;  %v327_v42 = vxor.u32 2147483648, %v382_v41 }
  0x70   :  { %v324_v50 = vxor.u32 2147483648, %v384_v40 }
  0x71   :  { %v328_v45 = vsel %vm326_vm3, %v327_v42, %v384_v40 }
  0x72   :  { %v325_v47 = vsel %vm323_vm4, %v382_v41, %v324_v50 }
  0x73   :  { %v329_v34 = vsel %vm322_vm5, %v325_v47, %v328_v45 }
  0x74   :  { %v330_v5 = vsel %vm319_vm6, nan, %v329_v34 }
  0x75   :  { %v332_v48 = vmul.f32 %v331_v46, %v330_v5 }
  0x77   :  { %333 = vst [vmem:[%s606_s1] sm:$0xff] %v332_v48 }

</bundles_post_ra>
